<compile_context>
chip_gen: v7x
topology: tpu7x:2x2x1
jax: 0.10.0
libtpu: 0.0.40
codegen_flags: <defaults>
</compile_context>

<pallas_src>
import functools

import jax
import jax.numpy as jnp
from jax.experimental import pallas as pl
from jax.experimental.pallas import tpu as pltpu


def _round_up(n, m):
    return ((n + m - 1) // m) * m


def mlp_kernel(x_ref, w1_ref, b1t_ref, w2_ref, b2_ref, o_ref):
    # Layer 1 on the MXU: (TB, 30) @ (30, 8) -> (TB, 8), f32 accumulation.
    h = jnp.dot(x_ref[...], w1_ref[...], preferred_element_type=jnp.float32)
    # One XLU transpose -> lane-dense (8, TB); bias add + tanh on packed vregs.
    ht = jnp.tanh(h.T + b1t_ref[...])                       # b1t: (8, 1) broadcasts over lanes
    # Layer 2 on VPU + sublane reduce (keeps the N=1 matmul off the MXU path).
    o = jnp.sum(ht * w2_ref[...], axis=0, keepdims=True)    # (1, TB)
    o = o + b2_ref[0, 0]                                    # scalar bias from SMEM
    o_ref[...] = o.astype(o_ref.dtype)


@functools.partial(jax.jit, static_argnames=("tile_b",))
def naive_fully_connected(x, w1, b1, w2, b2, *, tile_b=512):
    """x: (B, 30) f32; w1: (30, 8); b1: (1, 8); w2: (8, 1); b2: (1, 1). Returns (B, 1)."""
    B, F = x.shape
    assert F == 30

    # Batch tile: multiple of 128 so the lane-dense output block is unmasked,
    # capped so small batches do not over-pad.
    tb = min(tile_b, _round_up(max(B, 1), 128))
    num_tiles = pl.cdiv(B, tb)
    Bp = num_tiles * tb
    if Bp != B:
        x = jnp.pad(x, ((0, Bp - B), (0, 0)))  # zero-pad batch only; features stay at 30

    # Wrapper-side (free) re-layouts of the tiny parameters.
    b1t = jnp.reshape(b1, (1, 8)).T            # (8, 1): lane-broadcast bias after transpose
    w2c = jnp.reshape(w2, (8, 1))              # (8, 1): per-hidden-unit weight column
    b2s = jnp.reshape(b2, (1, 1))              # SMEM scalar

    param_bytes = (30 * 8 + 8 + 8 + 1) * 4
    cost = pl.CostEstimate(
        flops=2 * Bp * (30 * 8 + 8),
        transcendentals=Bp * 8,
        bytes_accessed=Bp * (30 + 1) * 4 + param_bytes,
    )

    out_row = pl.pallas_call(
        mlp_kernel,
        out_shape=jax.ShapeDtypeStruct((1, Bp), jnp.float32),
        grid=(num_tiles,),
        in_specs=[
            pl.BlockSpec((tb, 30), lambda i: (i, 0)),       # x: tiled over batch, full feature dim
            pl.BlockSpec((30, 8), lambda i: (0, 0)),        # w1: resident
            pl.BlockSpec((8, 1), lambda i: (0, 0)),         # b1^T: resident
            pl.BlockSpec((8, 1), lambda i: (0, 0)),         # w2: resident
            pl.BlockSpec(memory_space=pltpu.MemorySpace.SMEM),  # b2 scalar in SMEM
        ],
        out_specs=pl.BlockSpec((1, tb), lambda i: (0, i)),  # lane-dense output row
        compiler_params=pltpu.CompilerParams(
            dimension_semantics=("parallel",),
        ),
        cost_estimate=cost,
    )(x, w1, b1t, w2c, b2s)

    out = jnp.reshape(out_row, (Bp, 1))
    return out[:B] if Bp != B else out


def init_params(key):
    """Deterministic init mimicking PyTorch nn.Linear default (uniform +/- 1/sqrt(fan_in))."""
    k1, k2, k3, k4 = jax.random.split(key, 4)
    bound1 = 1.0 / jnp.sqrt(30.0)
    bound2 = 1.0 / jnp.sqrt(8.0)
    # Stored as (in, out) so the kernel does x @ W directly (== PyTorch x @ W^T + b).
    w1 = jax.random.uniform(k1, (30, 8), jnp.float32, -bound1, bound1)
    b1 = jax.random.uniform(k2, (1, 8), jnp.float32, -bound1, bound1)
    w2 = jax.random.uniform(k3, (8, 1), jnp.float32, -bound2, bound2)
    b2 = jax.random.uniform(k4, (1, 1), jnp.float32, -bound2, bound2)
    return w1, b1, w2, b2


def _reference(x, w1, b1, w2, b2):
    return jnp.tanh(x @ w1 + b1) @ w2 + b2


if __name__ == "__main__":
    key = jax.random.PRNGKey(0)
    kx, kx2, kp = jax.random.split(key, 3)
    w1, b1, w2, b2 = init_params(kp)

    # Small-batch case (matches the module's toy usage).
    B = 2
    x = jax.random.normal(kx, (B, 30), jnp.float32)
    out = jax.block_until_ready(naive_fully_connected(x, w1, b1, w2, b2))
    ref = _reference(x, w1, b1, w2, b2)
    assert out.shape == (B, 1)
    assert jnp.allclose(out, ref, atol=1e-5, rtol=1e-5)

    # Multi-tile + padded-tail case (exercises the batch grid and resident weights).
    B2 = 200
    x2 = jax.random.normal(kx2, (B2, 30), jnp.float32)
    out2 = jax.block_until_ready(
        naive_fully_connected(x2, w1, b1, w2, b2, tile_b=128)
    )
    ref2 = _reference(x2, w1, b1, w2, b2)
    assert out2.shape == (B2, 1)
    assert jnp.allclose(out2, ref2, atol=1e-5, rtol=1e-5)

    print("KERNEL_OK")
</pallas_src>

<mosaic_0001>
module attributes {stable_mosaic.version = 11 : i64} {
  func.func @mlp_kernel(%arg0: i32, %arg1: memref<128x30xf32, #tpu.memory_space<vmem>>, %arg2: memref<30x8xf32, #tpu.memory_space<vmem>>, %arg3: memref<8x1xf32, #tpu.memory_space<vmem>>, %arg4: memref<8x1xf32, #tpu.memory_space<vmem>>, %arg5: memref<1x1xf32, #tpu.memory_space<smem>>, %arg6: memref<1x128xf32, #tpu.memory_space<vmem>>) attributes {dimension_semantics = [#tpu.dimension_semantics<parallel>], iteration_bounds = array<i64: 1>, scalar_prefetch = 0 : i64, scratch_operands = 0 : i64, tpu.core_type = #tpu.core_type<tc>, window_params = [{transform_indices = @transform_0, window_bounds = array<i64: 128, 30>}, {pipeline_mode = #tpu.pipeline_mode<synchronous>, transform_indices = @transform_1, window_bounds = array<i64: 30, 8>}, {pipeline_mode = #tpu.pipeline_mode<synchronous>, transform_indices = @transform_2, window_bounds = array<i64: 8, 1>}, {pipeline_mode = #tpu.pipeline_mode<synchronous>, transform_indices = @transform_3, window_bounds = array<i64: 8, 1>}, {transform_indices = @transform_4, window_bounds = array<i64: 1, 1>}, {transform_indices = @transform_5, window_bounds = array<i64: 1, 128>}]} {
    %c0 = arith.constant 0 : index
    %c0_0 = arith.constant 0 : index
    %0 = vector.load %arg1[%c0, %c0_0] : memref<128x30xf32, #tpu.memory_space<vmem>>, vector<128x30xf32>
    %c0_1 = arith.constant 0 : index
    %c0_2 = arith.constant 0 : index
    %1 = vector.load %arg2[%c0_1, %c0_2] : memref<30x8xf32, #tpu.memory_space<vmem>>, vector<30x8xf32>
    %cst = arith.constant dense<0.000000e+00> : vector<128x8xf32>
    %2 = tpu.matmul %0, %1, %cst {dimension_numbers = #tpu.dot_dimension_numbers<[1], [0], [0], [1], [0, 0, 1, 1], [], []>} : vector<128x30xf32>, vector<30x8xf32>, vector<128x8xf32> -> vector<128x8xf32>
    %3 = tpu.transpose %2, [1, 0] : vector<128x8xf32> -> vector<8x128xf32>
    %c0_3 = arith.constant 0 : index
    %c0_4 = arith.constant 0 : index
    %4 = vector.load %arg3[%c0_3, %c0_4] : memref<8x1xf32, #tpu.memory_space<vmem>>, vector<8x1xf32>
    %5 = vector.broadcast %4 : vector<8x1xf32> to vector<8x128xf32>
    %6 = arith.addf %3, %5 : vector<8x128xf32>
    %7 = math.tanh %6 : vector<8x128xf32>
    %c0_5 = arith.constant 0 : index
    %c0_6 = arith.constant 0 : index
    %8 = vector.load %arg4[%c0_5, %c0_6] : memref<8x1xf32, #tpu.memory_space<vmem>>, vector<8x1xf32>
    %9 = vector.broadcast %8 : vector<8x1xf32> to vector<8x128xf32>
    %10 = arith.mulf %7, %9 : vector<8x128xf32>
    %cst_7 = arith.constant dense<0.000000e+00> : vector<128xf32>
    %11 = vector.multi_reduction <add>, %10, %cst_7 [0] : vector<8x128xf32> to vector<128xf32>
    %12 = vector.shape_cast %11 : vector<128xf32> to vector<1x128xf32>
    %c0_8 = arith.constant 0 : index
    %c0_9 = arith.constant 0 : index
    %13 = memref.load %arg5[%c0_8, %c0_9] : memref<1x1xf32, #tpu.memory_space<smem>>
    %14 = vector.broadcast %13 : f32 to vector<1x128xf32>
    %15 = arith.addf %12, %14 : vector<1x128xf32>
    %c0_10 = arith.constant 0 : index
    %c0_11 = arith.constant 0 : index
    %16 = vector.load %arg6[%c0_10, %c0_11] : memref<1x128xf32, #tpu.memory_space<vmem>>, vector<1x128xf32>
    tpu.vector_store %arg6[%c0_10, %c0_11], %15 {strides = array<i32>} : memref<1x128xf32, #tpu.memory_space<vmem>>, vector<1x128xf32>,
    return
  }
  func.func @transform_0(%arg0: i32) -> (i32, i32) {
    %c0_i32 = arith.constant 0 : i32
    %c0_i32_0 = arith.constant 0 : i32
    return %arg0, %c0_i32 : i32, i32
  }
  func.func @transform_1(%arg0: i32) -> (i32, i32) {
    %c0_i32 = arith.constant 0 : i32
    %c0_i32_0 = arith.constant 0 : i32
    %c0_i32_1 = arith.constant 0 : i32
    return %c0_i32, %c0_i32_0 : i32, i32
  }
  func.func @transform_2(%arg0: i32) -> (i32, i32) {
    %c0_i32 = arith.constant 0 : i32
    %c0_i32_0 = arith.constant 0 : i32
    %c0_i32_1 = arith.constant 0 : i32
    return %c0_i32, %c0_i32_0 : i32, i32
  }
  func.func @transform_3(%arg0: i32) -> (i32, i32) {
    %c0_i32 = arith.constant 0 : i32
    %c0_i32_0 = arith.constant 0 : i32
    %c0_i32_1 = arith.constant 0 : i32
    return %c0_i32, %c0_i32_0 : i32, i32
  }
  func.func @transform_4(%arg0: i32) -> (i32, i32) {
    %c0_i32 = arith.constant 0 : i32
    %c0_i32_0 = arith.constant 0 : i32
    %c0_i32_1 = arith.constant 0 : i32
    return %c0_i32, %c0_i32_0 : i32, i32
  }
  func.func @transform_5(%arg0: i32) -> (i32, i32) {
    %c0_i32 = arith.constant 0 : i32
    %c0_i32_0 = arith.constant 0 : i32
    return %c0_i32, %arg0 : i32, i32
  }
}

</mosaic_0001>

<bundles_post_ra>
// kernel: naive_fully_connected.1
= control target key start
LH: loop header
LB: loop body
LE: loop exit
PB: predicated region body
PF: predicated region fallthrough
CT: control target
= control target key end

     0   :  { %vm90_vm0 = vcmask 1045504   ;;  %vm41_vm1 = vcmask 244736   ;;  %v388_v3 = vmov 0   ;;  %vm389_vm2 = vmmov 1   ;;  %s508_s1 = inlined_call_operand.vmem [shape: f32[30,8], index: 1, kind: input, shape index: {}]   ;;  %s509_s0 = inlined_call_operand.vmem [shape: f32[128,30], index: 0, kind: input, shape index: {}]   ;;  %s510_s2 = inlined_call_operand.vmem [shape: f32[8,1], index: 2, kind: input, shape index: {}]   ;;  %s511_s3 = inlined_call_operand.vmem [shape: f32[8,1], index: 3, kind: input, shape index: {}]   ;;  %s512_s4 = inlined_call_operand.<no memory space> [shape: f32[1,1], index: 4, kind: input, shape index: {}]   ;;  %s513_s5 = inlined_call_operand.vmem [shape: f32[1,128], index: 5, kind: output, shape index: {}]  }
   0x1   :  { %v37_v0 = vld [vmem:[%s508_s1] sm:$0xff]  ;;  %v38_v1 = vld [vmem:[%s508_s1 + $0x8] sm:$0xff]  ;;  %v39_v2 = vld [vmem:[%s508_s1 + $0x10] sm:$0xff]  ;;  %385 = vset.pattern.permute.xlu0 %v388_v3  ;;  %v293_v52 = vstv %s512_s4 }
   0x2   :  { %v369_v4 = vpack.c.bf16 %v38_v1, %v37_v0  ;;  %v40_v5 = vld [vmem:[%s508_s1 + $0x18] sm:$0x3f]  ;;  %v21_v6 = vld [vmem:[%s509_s0] sm:$0xff]  ;;  %vm374_vm3 = vmpackc.low %vm90_vm0, %vm389_vm2 }
   0x3   :  { %v373_v7 = vpack.c.bf16 %v40_v5, %v39_v2  ;;  %345 = vmatprep.mubr.msk.f32.mxu0 %vm41_vm1, %v21_v6  ;;  %v29_v8 = vld [vmem:[%s509_s0 + $0x40] sm:$0xff]  ;;  %v22_v10 = vld [vmem:[%s509_s0 + $0x8] sm:$0xff]  ;;  %v23_v12 = vld [vmem:[%s509_s0 + $0x10] sm:$0xff] }
   0x4   :  { %370 = vmatprep.subr.bf16.mxu0 %v369_v4  ;;  %379 = vmatprep.subr.bf16.mxu1 %v369_v4  ;;  %v271_v9 = vld [vmem:[%s510_s2] sm:$0xff]  ;;  %v30_v11 = vld [vmem:[%s509_s0 + $0x48] sm:$0xff]  ;;  %v31_v13 = vld [vmem:[%s509_s0 + $0x50] sm:$0xff] }
   0x5   :  { %372 = vmatpush3.bf16.msra.mxu0 %v369_v4  ;;  %381 = vmatpush3.bf16.msra.mxu1 %v369_v4  ;;  %v24_v14 = vld [vmem:[%s509_s0 + $0x18] sm:$0xff]  ;;  %v25_v16 = vld [vmem:[%s509_s0 + $0x20] sm:$0xff]  ;;  %v26_v18 = vld [vmem:[%s509_s0 + $0x28] sm:$0xff] }
   0x6   :  { %375 = vmatprep.subr.msk.bf16.mxu0 %vm374_vm3, %v373_v7  ;;  %380 = vmatprep.subr.msk.bf16.mxu1 %vm374_vm3, %v373_v7  ;;  %v32_v15 = vld [vmem:[%s509_s0 + $0x58] sm:$0xff]  ;;  %v33_v17 = vld [vmem:[%s509_s0 + $0x60] sm:$0xff]  ;;  %v34_v19 = vld [vmem:[%s509_s0 + $0x68] sm:$0xff] }
   0x7   :  { %357 = vmatprep.mubr.msk.f32.mxu1 %vm41_vm1, %v29_v8  ;;  %274 = vperm.xlu0 %385, %v271_v9   ;;  %v27_v20 = vld [vmem:[%s509_s0 + $0x30] sm:$0xff]  ;;  %v28_v22 = vld [vmem:[%s509_s0 + $0x38] sm:$0xff]  ;;  %v279_v24 = vld [vmem:[%s511_s3] sm:$0xff] }
   0x8   :  { %v35_v21 = vld [vmem:[%s509_s0 + $0x70] sm:$0xff]  ;;  %v36_v23 = vld [vmem:[%s509_s0 + $0x78] sm:$0xff] }
   0x9   :  { %378 = vmatpush3.bf16.msk.msra.mxu0 %vm374_vm3, %v373_v7  ;;  %382 = vmatpush3.bf16.msk.msra.mxu1 %vm374_vm3, %v373_v7 }
   0xb   :  { %282 = vperm.xlu0 %385, %v279_v24  }
   0xc   :  { %346 = vmatmul.mubr.msk.f32.vlgmr.msra.gmra.mrb[0].mxu0 %vm41_vm1, %v22_v10  ;;  %358 = vmatmul.mubr.msk.f32.vlgmr.msra.gmra.mrb[0].mxu1 %vm41_vm1, %v30_v11 }
   0xd   :  { %348 = vmatprep.mubr.msk.f32.mxu0 %vm41_vm1, %v23_v12  ;;  %360 = vmatprep.mubr.msk.f32.mxu1 %vm41_vm1, %v31_v13 }
  0x10   :  { %349 = vmatmul.mubr.msk.f32.gmra.mrb[2].mxu0 %vm41_vm1, %v24_v14  ;;  %361 = vmatmul.mubr.msk.f32.gmra.mrb[2].mxu1 %vm41_vm1, %v32_v15 }
  0x11   :  { %351 = vmatprep.mubr.msk.f32.mxu0 %vm41_vm1, %v25_v16  ;;  %363 = vmatprep.mubr.msk.f32.mxu1 %vm41_vm1, %v33_v17 }
  0x14   :  { %352 = vmatmul.mubr.msk.f32.gmra.mrb[4].mxu0 %vm41_vm1, %v26_v18  ;;  %364 = vmatmul.mubr.msk.f32.gmra.mrb[4].mxu1 %vm41_vm1, %v34_v19 }
  0x15   :  { %354 = vmatprep.mubr.msk.f32.mxu0 %vm41_vm1, %v27_v20  ;;  %366 = vmatprep.mubr.msk.f32.mxu1 %vm41_vm1, %v35_v21 }
  0x18   :  { %355 = vmatmul.mubr.msk.f32.gmra.mrb[6].mxu0 %vm41_vm1, %v28_v22  ;;  %367 = vmatmul.mubr.msk.f32.gmra.mrb[6].mxu1 %vm41_vm1, %v36_v23 }
  0x86   :  { %v275_v41 = vpop.permute.xlu0 %274 }
  0x8a   :  { %v283_v45 = vpop.permute.xlu0 %282 }
  0xdf   :  { %v347_v25 = vpop.f32.mrb[0].mxu0  ;;  %v359_v26 = vpop.f32.mrb[0].mxu1 }
  0xe0   :  { %v160_v27 = vpop.f32.mrb[1].mxu0  ;;  %v200_v28 = vpop.f32.mrb[1].mxu1 }
  0xe1   :  { %239 = vxpose.xlu1.b32.start [1/16] (narrow) %v160_v27, 8 }
  0xe3   :  { %v350_v29 = vpop.f32.mrb[2].mxu0  ;;  %v362_v30 = vpop.f32.mrb[2].mxu1 }
  0xe4   :  { %v170_v31 = vpop.f32.mrb[3].mxu0  ;;  %v210_v32 = vpop.f32.mrb[3].mxu1 }
  0xe5   :  { %240 = vxpose.xlu1.b32.cont [2/16] (narrow) %v347_v25, 8 }
  0xe7   :  { %v353_v33 = vpop.f32.mrb[4].mxu0  ;;  %v365_v34 = vpop.f32.mrb[4].mxu1 }
  0xe8   :  { %v180_v35 = vpop.f32.mrb[5].mxu0  ;;  %v220_v36 = vpop.f32.mrb[5].mxu1 }
  0xe9   :  { %241 = vxpose.xlu1.b32.cont [3/16] (narrow) %v170_v31, 8 }
  0xeb   :  { %v356_v37 = vpop.f32.mrb[6].mxu0  ;;  %v368_v38 = vpop.f32.mrb[6].mxu1 }
  0xec   :  { %v190_v39 = vpop.f32.mrb[7].mxu0  ;;  %v230_v40 = vpop.f32.mrb[7].mxu1 }
  0xed   :  { %242 = vxpose.xlu1.b32.cont [4/16] (narrow) %v350_v29, 8 }
  0xf1   :  { %243 = vxpose.xlu1.b32.cont [5/16] (narrow) %v180_v35, 8 }
  0xf5   :  { %244 = vxpose.xlu1.b32.cont [6/16] (narrow) %v353_v33, 8 }
  0xf9   :  { %245 = vxpose.xlu1.b32.cont [7/16] (narrow) %v190_v39, 8 }
  0xfd   :  { %246 = vxpose.xlu1.b32.cont [8/16] (narrow) %v356_v37, 8 }
 0x101   :  { %247 = vxpose.xlu1.b32.cont [9/16] (narrow) %v200_v28, 8 }
 0x105   :  { %248 = vxpose.xlu1.b32.cont [10/16] (narrow) %v359_v26, 8 }
 0x109   :  { %249 = vxpose.xlu1.b32.cont [11/16] (narrow) %v210_v32, 8 }
 0x10d   :  { %250 = vxpose.xlu1.b32.cont [12/16] (narrow) %v362_v30, 8 }
 0x111   :  { %251 = vxpose.xlu1.b32.cont [13/16] (narrow) %v220_v36, 8 }
 0x115   :  { %252 = vxpose.xlu1.b32.cont [14/16] (narrow) %v365_v34, 8 }
 0x119   :  { %253 = vxpose.xlu1.b32.cont [15/16] (narrow) %v230_v40, 8 }
 0x11d   :  { %254 = vxpose.xlu1.b32.end [16/16] (narrow) %v368_v38, 8 }
 0x161   :  { %v255_v42 = vpop.trf.xlu1 }
 0x162   :  { %v277_v43 = vadd.f32 %v275_v41, %v255_v42 }
 0x164   :  { %386 = vtanh.f32 %v277_v43 }
 0x16e   :  { %v387_v44 = vpop.eup %386 }
 0x16f   :  { %v285_v46 = vmul.f32 %v387_v44, %v283_v45 }
 0x171   :  { %v286_v47 = vrot.slane %v285_v46, 4 }
 0x173   :  { %v287_v48 = vadd.f32 %v286_v47, %v285_v46 }
 0x175   :  { %v288_v49 = vrot.slane %v287_v48, 2 }
 0x177   :  { %v289_v50 = vadd.f32 %v288_v49, %v287_v48 }
 0x179   :  { %v290_v51 = vrot.slane %v289_v50, 1 }
 0x17b   :  { %v291_v53 = vadd.f32 %v290_v51, %v289_v50 }
 0x17d   :  { %v294_v54 = vadd.f32 %v293_v52, %v291_v53 }
 0x17f   :  { %295 = vst [vmem:[%s513_s5] sm:$0x1] %v294_v54 }

</bundles_post_ra>
